<compile_context>
chip_gen: v5e
topology: v5e:2x2
jax: 0.10.0
libtpu: 0.0.40
codegen_flags: <defaults>
</compile_context>

<pallas_src>
import functools

import jax
import jax.numpy as jnp
from jax.experimental import pallas as pl
from jax.experimental.pallas import tpu as pltpu


def se_block_kernel(x_ref, w1t_ref, w2t_ref, o_ref, acc_ref, *, l_tile, n_l, inv_l):
    """One (batch, L-tile) grid step.

    x_ref   : (1, C, L_TILE) native dtype   -- pipelined input tile
    w1t_ref : (C, H) f32                    -- W1.T, VMEM-resident (constant index map)
    w2t_ref : (H, C) f32                    -- W2.T, VMEM-resident
    o_ref   : (1, C, L) native dtype        -- full per-batch slab, revisited across L axis
    acc_ref : (1, C) f32 scratch            -- running channel sums
    """
    li = pl.program_id(1)

    @pl.when(li == 0)
    def _init():
        acc_ref[...] = jnp.zeros_like(acc_ref)

    # Stash the incoming tile into the resident output slab (x is only read
    # from HBM once) and accumulate channel-wise partial sums in f32.
    x_tile = x_ref[...]                                            # (1, C, Lt)
    if n_l == 1:
        o_ref[...] = x_tile
    else:
        start = pl.multiple_of(li * l_tile, l_tile)                # lane-aligned (Lt % 128 == 0)
        o_ref[:, :, pl.ds(start, l_tile)] = x_tile
    acc_ref[...] += jnp.sum(x_tile.astype(jnp.float32), axis=-1)   # (1, C) f32

    @pl.when(li == pl.num_programs(1) - 1)
    def _finalize():
        # Squeeze: mean over the true (untiled) L.
        y = acc_ref[...] * inv_l                                   # (1, C) f32
        # Excitation MLP (tiny; free filler on the MXU), f32 accumulation.
        hid = jnp.dot(y, w1t_ref[...], preferred_element_type=jnp.float32)
        hid = jnp.maximum(hid, 0.0)
        s = jnp.dot(hid, w2t_ref[...], preferred_element_type=jnp.float32)
        s = jax.nn.sigmoid(s)                                      # (1, C) f32
        # Broadcast the gate once, then scale the whole resident slab in place.
        # Native-dtype multiply/store (halves vst traffic for bf16 on v6e/v7x).
        gate = s[:, :, None].astype(o_ref.dtype)                   # (1, C, 1)
        o_ref[...] = o_ref[...] * gate


def se_block(x, w1, w2, *, l_tile_target=512):
    """x: (B, C, L) float dtype; w1: (C//r, C); w2: (C, C//r) -- torch Linear layout."""
    b, c, l = x.shape
    h_dim = w1.shape[0]
    assert w1.shape == (h_dim, c) and w2.shape == (c, h_dim)

    # Pre-transpose the tiny weights (f32) so the kernel does plain row-major matmuls.
    w1t = jnp.asarray(w1, jnp.float32).T        # (C, H)
    w2t = jnp.asarray(w2, jnp.float32).T        # (H, C)

    # Lane-dense L tile: largest multiple of 128 that divides L and is <= target.
    # Fall back to the full L extent (single tile) if L is not 128-divisible.
    l_tile = l
    if l % 128 == 0:
        cands = [t for t in range(128, min(l, l_tile_target) + 1, 128) if l % t == 0]
        if cands:
            l_tile = max(cands)
    n_l = l // l_tile

    # VMEM budget: double-buffered resident output slab + double-buffered input
    # tiles + weights/accumulator (with headroom).  Sized for the smallest VMEM
    # generation (v7x, 64 MiB) at realistic shapes; tiny for the demo.
    itemsize = jnp.dtype(x.dtype).itemsize
    vmem_bytes = 2 * c * l * itemsize            # output slab (double-buffered)
    vmem_bytes += 2 * c * l_tile * itemsize      # pipelined input tiles
    vmem_bytes += 2 * c * h_dim * 4 + 8 * 128 * 4  # weights + padded f32 accumulator
    vmem_limit = int(min(max(2 * vmem_bytes, 8 * 1024 * 1024), 100 * 1024 * 1024))

    kernel = functools.partial(se_block_kernel, l_tile=l_tile, n_l=n_l, inv_l=1.0 / l)

    grid_spec = pltpu.PrefetchScalarGridSpec(
        num_scalar_prefetch=0,
        grid=(b, n_l),
        in_specs=[
            # x: one (C, L_TILE) tile per step -> auto double-buffered DMA.
            pl.BlockSpec((1, c, l_tile), lambda bi, li: (bi, 0, li)),
            # Tiny weights: constant index map -> loaded once, stay resident.
            pl.BlockSpec((c, h_dim), lambda bi, li: (0, 0)),
            pl.BlockSpec((h_dim, c), lambda bi, li: (0, 0)),
        ],
        # Output: full per-batch slab, revisited across the L axis, written back
        # to HBM once per batch.
        out_specs=pl.BlockSpec((1, c, l), lambda bi, li: (bi, 0, 0)),
        scratch_shapes=[pltpu.VMEM((1, c), jnp.float32)],
    )

    return pl.pallas_call(
        kernel,
        out_shape=jax.ShapeDtypeStruct((b, c, l), x.dtype),
        grid_spec=grid_spec,
        compiler_params=pltpu.CompilerParams(
            dimension_semantics=("parallel", "arbitrary"),
            vmem_limit_bytes=vmem_limit,
        ),
    )(x, w1t, w2t)


def se_block_ref(x, w1, w2):
    """Pure-JAX reference mirroring the PyTorch forward (f32 math)."""
    xf = x.astype(jnp.float32)
    y = jnp.mean(xf, axis=-1)                                          # (B, C)
    hid = jnp.maximum(y @ jnp.asarray(w1, jnp.float32).T, 0.0)         # (B, H)
    s = jax.nn.sigmoid(hid @ jnp.asarray(w2, jnp.float32).T)           # (B, C)
    return xf * s[:, :, None]


if __name__ == "__main__":
    root = jax.random.PRNGKey(0)
    k1a, k1b, k1c, k2a, k2b, k2c = jax.random.split(root, 6)

    # Case 1: f32, L split into two lane-dense 512-wide tiles (exercises the
    # partial-sum accumulation + revisited-output path).
    B, C, L, reduction = 4, 64, 1024, 16
    H = C // reduction
    x = jax.random.normal(k1a, (B, C, L), dtype=jnp.float32)
    w1 = jax.random.normal(k1b, (H, C), dtype=jnp.float32) * 0.2    # Linear(C -> H), no bias
    w2 = jax.random.normal(k1c, (C, H), dtype=jnp.float32) * 0.2    # Linear(H -> C), no bias
    out = jax.block_until_ready(se_block(x, w1, w2))
    ref = se_block_ref(x, w1, w2)
    assert out.shape == (B, C, L) and out.dtype == x.dtype
    assert jnp.allclose(out, ref, atol=1e-5, rtol=1e-5)

    # Case 2: bf16 input kept in native dtype end-to-end (f32 accumulation only
    # inside the kernel), L not a multiple of 128 -> single full-extent tile.
    B2, C2, L2, red2 = 2, 32, 96, 16
    H2 = C2 // red2
    xb = jax.random.normal(k2a, (B2, C2, L2), dtype=jnp.float32).astype(jnp.bfloat16)
    w1b = jax.random.normal(k2b, (H2, C2), dtype=jnp.float32) * 0.2
    w2b = jax.random.normal(k2c, (C2, H2), dtype=jnp.float32) * 0.2
    outb = jax.block_until_ready(se_block(xb, w1b, w2b))
    refb = se_block_ref(xb, w1b, w2b)
    assert outb.shape == (B2, C2, L2) and outb.dtype == jnp.bfloat16
    assert jnp.allclose(outb.astype(jnp.float32), refb, atol=3e-2, rtol=3e-2)

    print("KERNEL_OK")
</pallas_src>

<mosaic_0001>
module attributes {stable_mosaic.version = 11 : i64} {
  func.func @se_block_kernel(%arg0: i32, %arg1: i32, %arg2: memref<1x64x512xf32, #tpu.memory_space<vmem>>, %arg3: memref<64x4xf32, #tpu.memory_space<vmem>>, %arg4: memref<4x64xf32, #tpu.memory_space<vmem>>, %arg5: memref<1x64x1024xf32, #tpu.memory_space<vmem>>, %arg6: memref<1x64xf32, #tpu.memory_space<vmem>>) attributes {dimension_semantics = [#tpu.dimension_semantics<parallel>, #tpu.dimension_semantics<arbitrary>], iteration_bounds = array<i64: 4, 2>, scalar_prefetch = 0 : i64, scratch_operands = 1 : i64, tpu.core_type = #tpu.core_type<tc>, window_params = [{transform_indices = @transform_0, window_bounds = array<i64: 1, 64, 512>}, {pipeline_mode = #tpu.pipeline_mode<synchronous>, transform_indices = @transform_1, window_bounds = array<i64: 64, 4>}, {pipeline_mode = #tpu.pipeline_mode<synchronous>, transform_indices = @transform_2, window_bounds = array<i64: 4, 64>}, {transform_indices = @transform_3, window_bounds = array<i64: 1, 64, 1024>}]} {
    %c0_i32 = arith.constant 0 : i32
    %0 = arith.cmpi eq, %arg1, %c0_i32 : i32
    %1 = arith.extui %0 : i1 to i32
    %c0_i32_0 = arith.constant 0 : i32
    %2 = arith.cmpi ne, %1, %c0_i32_0 : i32
    scf.if %2 {
      %cst_10 = arith.constant 0.000000e+00 : f32
      %15 = vector.broadcast %cst_10 : f32 to vector<1x64xf32>
      %c0_11 = arith.constant 0 : index
      %c0_12 = arith.constant 0 : index
      %16 = vector.load %arg6[%c0_11, %c0_12] : memref<1x64xf32, #tpu.memory_space<vmem>>, vector<1x64xf32>
      tpu.vector_store %arg6[%c0_11, %c0_12], %15 {strides = array<i32>} : memref<1x64xf32, #tpu.memory_space<vmem>>, vector<1x64xf32>,
    } else {
    }
    %c0 = arith.constant 0 : index
    %c0_1 = arith.constant 0 : index
    %c0_2 = arith.constant 0 : index
    %3 = vector.load %arg2[%c0, %c0_1, %c0_2] : memref<1x64x512xf32, #tpu.memory_space<vmem>>, vector<1x64x512xf32>
    %c512_i32 = arith.constant 512 : i32
    %4 = arith.muli %arg1, %c512_i32 : i32
    %5 = tpu.assume_multiple %4, 512 : i32
    %c0_3 = arith.constant 0 : index
    %c0_4 = arith.constant 0 : index
    %6 = arith.index_cast %5 : i32 to index
    %7 = vector.load %arg5[%c0_3, %c0_4, %6] : memref<1x64x1024xf32, #tpu.memory_space<vmem>>, vector<1x64x512xf32>
    tpu.vector_store %arg5[%c0_3, %c0_4, %6], %3 {strides = array<i32>} : memref<1x64x1024xf32, #tpu.memory_space<vmem>>, vector<1x64x512xf32>,
    %c0_5 = arith.constant 0 : index
    %c0_6 = arith.constant 0 : index
    %8 = vector.load %arg6[%c0_5, %c0_6] : memref<1x64xf32, #tpu.memory_space<vmem>>, vector<1x64xf32>
    %cst = arith.constant dense<0.000000e+00> : vector<1x64xf32>
    %9 = vector.multi_reduction <add>, %3, %cst [2] : vector<1x64x512xf32> to vector<1x64xf32>
    %10 = arith.addf %8, %9 : vector<1x64xf32>
    %c0_7 = arith.constant 0 : index
    %c0_8 = arith.constant 0 : index
    %11 = vector.load %arg6[%c0_7, %c0_8] : memref<1x64xf32, #tpu.memory_space<vmem>>, vector<1x64xf32>
    tpu.vector_store %arg6[%c0_7, %c0_8], %10 {strides = array<i32>} : memref<1x64xf32, #tpu.memory_space<vmem>>, vector<1x64xf32>,
    %c1_i32 = arith.constant 1 : i32
    %12 = arith.cmpi eq, %arg1, %c1_i32 : i32
    %13 = arith.extui %12 : i1 to i32
    %c0_i32_9 = arith.constant 0 : i32
    %14 = arith.cmpi ne, %13, %c0_i32_9 : i32
    scf.if %14 {
      %c0_10 = arith.constant 0 : index
      %c0_11 = arith.constant 0 : index
      %15 = vector.load %arg6[%c0_10, %c0_11] : memref<1x64xf32, #tpu.memory_space<vmem>>, vector<1x64xf32>
      %cst_12 = arith.constant 9.765625E-4 : f32
      %16 = vector.broadcast %cst_12 : f32 to vector<1x64xf32>
      %17 = arith.mulf %15, %16 : vector<1x64xf32>
      %c0_13 = arith.constant 0 : index
      %c0_14 = arith.constant 0 : index
      %18 = vector.load %arg3[%c0_13, %c0_14] : memref<64x4xf32, #tpu.memory_space<vmem>>, vector<64x4xf32>
      %cst_15 = arith.constant dense<0.000000e+00> : vector<1x4xf32>
      %19 = tpu.matmul %17, %18, %cst_15 {dimension_numbers = #tpu.dot_dimension_numbers<[1], [0], [0], [1], [0, 0, 1, 1], [], []>} : vector<1x64xf32>, vector<64x4xf32>, vector<1x4xf32> -> vector<1x4xf32>
      %cst_16 = arith.constant 0.000000e+00 : f32
      %20 = vector.broadcast %cst_16 : f32 to vector<1x4xf32>
      %21 = arith.maximumf %19, %20 : vector<1x4xf32>
      %c0_17 = arith.constant 0 : index
      %c0_18 = arith.constant 0 : index
      %22 = vector.load %arg4[%c0_17, %c0_18] : memref<4x64xf32, #tpu.memory_space<vmem>>, vector<4x64xf32>
      %cst_19 = arith.constant dense<0.000000e+00> : vector<1x64xf32>
      %23 = tpu.matmul %21, %22, %cst_19 {dimension_numbers = #tpu.dot_dimension_numbers<[1], [0], [0], [1], [0, 0, 1, 1], [], []>} : vector<1x4xf32>, vector<4x64xf32>, vector<1x64xf32> -> vector<1x64xf32>
      %24 = arith.negf %23 : vector<1x64xf32>
      %25 = math.exp %24 : vector<1x64xf32>
      %cst_20 = arith.constant 1.000000e+00 : f32
      %26 = vector.broadcast %cst_20 : f32 to vector<1x64xf32>
      %27 = arith.addf %26, %25 : vector<1x64xf32>
      %28 = arith.divf %26, %27 : vector<1x64xf32>
      %29 = vector.shape_cast %28 : vector<1x64xf32> to vector<1x64x1xf32>
      %c0_21 = arith.constant 0 : index
      %c0_22 = arith.constant 0 : index
      %c0_23 = arith.constant 0 : index
      %30 = vector.load %arg5[%c0_21, %c0_22, %c0_23] : memref<1x64x1024xf32, #tpu.memory_space<vmem>>, vector<1x64x1024xf32>
      %31 = vector.broadcast %29 : vector<1x64x1xf32> to vector<1x64x1024xf32>
      %32 = arith.mulf %30, %31 : vector<1x64x1024xf32>
      %c0_24 = arith.constant 0 : index
      %c0_25 = arith.constant 0 : index
      %c0_26 = arith.constant 0 : index
      %33 = vector.load %arg5[%c0_24, %c0_25, %c0_26] : memref<1x64x1024xf32, #tpu.memory_space<vmem>>, vector<1x64x1024xf32>
      tpu.vector_store %arg5[%c0_24, %c0_25, %c0_26], %32 {strides = array<i32>} : memref<1x64x1024xf32, #tpu.memory_space<vmem>>, vector<1x64x1024xf32>,
    } else {
    }
    return
  }
  func.func @transform_0(%arg0: i32, %arg1: i32) -> (i32, i32, i32) {
    %c0_i32 = arith.constant 0 : i32
    %c0_i32_0 = arith.constant 0 : i32
    return %arg0, %c0_i32, %arg1 : i32, i32, i32
  }
  func.func @transform_1(%arg0: i32, %arg1: i32) -> (i32, i32) {
    %c0_i32 = arith.constant 0 : i32
    %c0_i32_0 = arith.constant 0 : i32
    %c0_i32_1 = arith.constant 0 : i32
    return %c0_i32, %c0_i32_0 : i32, i32
  }
  func.func @transform_2(%arg0: i32, %arg1: i32) -> (i32, i32) {
    %c0_i32 = arith.constant 0 : i32
    %c0_i32_0 = arith.constant 0 : i32
    %c0_i32_1 = arith.constant 0 : i32
    return %c0_i32, %c0_i32_0 : i32, i32
  }
  func.func @transform_3(%arg0: i32, %arg1: i32) -> (i32, i32, i32) {
    %c0_i32 = arith.constant 0 : i32
    %c0_i32_0 = arith.constant 0 : i32
    %c0_i32_1 = arith.constant 0 : i32
    return %arg0, %c0_i32, %c0_i32_0 : i32, i32, i32
  }
}

</mosaic_0001>

<bundles_post_ra>
// kernel: tpu_custom_call.1
= control target key start
LH: loop header
LB: loop body
LE: loop exit
PB: predicated region body
PF: predicated region fallthrough
CT: control target
= control target key end

     0   :  { %8 = vsyncpa [#allocation4], 0  ;;  %s1700_s0 = inlined_call_operand.hbm [shape: f32[4,64,1024], index: 0, kind: input, shape index: {}]   ;;  %s1701_s1 = inlined_call_operand.vmem [shape: f32[64,4], index: 1, kind: input, shape index: {}]   ;;  %s1702_s2 = inlined_call_operand.vmem [shape: f32[4,64], index: 2, kind: input, shape index: {}]   ;;  %s1703_s3 = inlined_call_operand.hbm [shape: f32[4,64,1024], index: 3, kind: output, shape index: {}]  }
   0x1   :  { %10 = vsyncpa [#allocation4 + $0x1], 0 }
   0x2   :  { %11 = vsyncpa [#allocation5], 0 }
   0x3   :  { %13 = vsyncpa [#allocation5 + $0x1], 0  ;;  %s1298_s12 = smov 0   ;;  %s1300_s13 = smov 0  }
   0x4   :  { %s1302_s14 = smov 0   ;;  %s1304_s15 = smov 0  }
   0x5   :  { %s1306_s16 = smov 0   ;;  %s1308_s17 = smov 0  }
   0x6   :  { %s1310_s18 = smov 0   ;;  %s1312_s19 = smov 0  }
   0x7   :  { %s1314_s20 = smov 0   ;;  %s1316_s21 = smov 0  }
   0x8   :  { %s1318_s22 = smov 0  }
   0x9 LB: > { %1709 = sst [smem:[#allocation9_spill]] %s1237_s14  ;;  %s967_s23 = sadd.s32 4294967295, %s1269_s22   ;;  %s1269_s22 = sphi %s1318_s22, %s19_s22   ;;  %s1265_s21 = sphi %s1316_s21, %s1732_s21   ;;  %s1261_s20 = sphi %s1314_s20, %s1725_s20   ;;  %s1257_s19 = sphi %s1312_s19, %s1731_s19   ;;  %s1253_s18 = sphi %s1310_s18, %s1724_s18   ;;  %s1249_s17 = sphi %s1308_s17, %s1723_s17   ;;  %s1245_s16 = sphi %s1306_s16, %s1730_s16   ;;  %s1241_s15 = sphi %s1304_s15, %s1729_s15   ;;  %s1237_s14 = sphi %s1302_s14, %s1721_s14   ;;  %s1233_s13 = sphi %s1300_s13, %s1728_s13   ;;  %s1229_s12 = sphi %s1298_s12, %s1727_s12  }
   0xa   : > { %1710 = sst [smem:[#allocation10_spill]] %s1249_s17  ;;  %s968_s24 = sadd.s32 4294967294, %s1269_s22  }
   0xb   : > { %1711 = sst [smem:[#allocation11_spill]] %s1261_s20  ;;  %s28_s25 = sadd.s32 1, %s1261_s20 }
   0xc   : > { %s31_s26 = sadd.s32 1, %s1265_s21  ;;  %p29_p0 = scmp.ge.s32.totalorder %s28_s25, 2 }
   0xd   : > { %s40_s27 = sadd.s32 1, %s1249_s17  ;;  %p47_p1 = scmp.ne.s32.totalorder %s1249_s17, %s1245_s16 }
   0xe   : > { %p48_p2 = scmp.eq.s32.totalorder %s1269_s22, 0  ;;  %s1734_s25 = smov (%p29_p0, %s28_s25), 0 }
   0xf   : > { %1712 = sst [smem:[#allocation12_spill]] %s1734_s25  ;;  %s1736_s26 = smov (!%p29_p0, %s31_s26), %s1265_s21 }
  0x10   : > { %s36_s28 = ssub.s32 %s1261_s20, %s1734_s25  ;;  %p1364_p3 = por %p48_p2, %p47_p1 }
  0x11   : > { %p33_p4 = scmp.ge.s32.totalorder %s1736_s26, 4  ;;  %p53_p5 = scmp.ne.s32.totalorder %s1245_s16, %s1241_s15 }
  0x12   : > { %p54_p6 = scmp.eq.s32.totalorder %s967_s23, 0  ;;  %s108_s30 = sadd.s32 1, %s1237_s14 }
  0x13   : > { %s1738_s26 = smov (%p33_p4, %s1736_s26), 0  ;;  %p118_p8 = scmp.ne.s32.totalorder %s1237_s14, %s1233_s13 }
  0x14   : > { %1714 = sst [smem:[#allocation13_spill]] %s1738_s26  ;;  %p1372_p7 = por %p54_p6, %p53_p5 }
  0x15   : > { %s35_s5 = ssub.s32 %s1265_s21, %s1738_s26  ;;  %p119_p9 = scmp.eq.s32.totalorder %s967_s23, 7 }
  0x16   : > { %s37_s6 = sor.u32 %s36_s28, %s35_s5  ;;  %p106_p10 = scmp.eq.s32.totalorder %s35_s5, 0 }
  0x17   : > { %p38_p11 = scmp.eq.s32.totalorder %s37_s6, 0  ;;  %p1380_p12 = por %p119_p9, %p118_p8 }
  0x18   : > { %s1385_s8 = scalar_select %p106_p10, %s1237_s14, %s108_s30  }
  0x19   : > { %s1388_s9 = scalar_select %p38_p11, %s1249_s17, %s40_s27  }
  0x1a   : > { %1717 = sst [smem:[#allocation14_spill]] %s1385_s8  ;;  %p124_p13 = scmp.ne.s32.totalorder %s1233_s13, %s1229_s12 }
  0x1b   : > { %1718 = sst [smem:[#allocation15_spill]] %s1388_s9  ;;  %p125_p0 = scmp.eq.s32.totalorder %s968_s24, 7 }
  0x1c   : > { %p1004_p1 = scmp.lt.s32.totalorder %s1269_s22, 8  ;;  %s151_s11 = sand.u32 1, %s1249_s17  }
  0x1d   : > { %p1393_p2 = por %p125_p0, %p124_p13  ;;  %s971_s15 = sshll.u32 %s151_s11, 8 }
  0x1e   : > { %s972_s23 = sshll.u32 %s1261_s20, 2  ;;  %s973_s28 = sshll.u32 %s1265_s21, 6 }
  0x1f   : > { %s155_s5 = scalar_lea.vmem [#allocation3], %s971_s15  ;;  %s160_s26 = sadd.s32 %s973_s28, %s972_s23 }
  0x20   : > { %s165_s6 = sshll.u32 %s155_s5, 4  ;;  %s974_s30 = sshll.u32 %s160_s26, 3  ;;  %s166_s6 = int_to_ptr.vmem [resolvable:$true] %s165_s6 }
  0x21   : > { %p997_p4 = pnand %p1004_p1, %p1364_p3  ;;  %s162_s25 = scalar_lea.hbm %s1700_s0, %s974_s30 }
  0x22   : > { %s163_s9 = sshll.u32 %s162_s25, 4  ;;  %p975_p5 = scmp.ge.s32.totalorder %s1269_s22, 1  ;;  %s164_s9 = int_to_ptr.hbm [resolvable:$true] %s163_s9 }
  0x23   : > { %s152_s8 = scalar_lea.sflag [#allocation4], %s151_s11  ;;  %s1271_s17 = smov 1024  }
  0x24   : > { %s1272_s14 = smov 512   ;;  %s1273_s20 = smov 32  }
  0x25   : > { %999 = dma.hbm_to_vmem [thread:$0]  (!%p997_p4), %s164_s9, 4096, %s166_s6, %s152_s8, %s1271_s17, %s1272_s14, %s1273_s20  }
  0x26   : > { %p173_p6 = scmp.lt.s32.totalorder %s1269_s22, 9 }
  0x28   : > { %p174_p8 = pnand %p975_p5, %p173_p6 }
  0x29   : > { %s179_s26 = sand.u32 (!%p174_p8), 1, %s1245_s16  }
  0x2a   : > { %177 = sbr.rel (%p174_p8) target bundleno = 904 (0x388), region = 32  ;;  %s976_s29 = sshll.u32 (!%p174_p8), %s179_s26, 8 }
  0x2b   : > { %s180_s15 = scalar_lea.sflag (!%p174_p8), [#allocation4], %s179_s26  ;;  %s1408_s23 = scalar_lea.vmem (!%p174_p8), [#allocation3], %s976_s29 }
  0x2f   : > { %1220 = dma.done.wait (%p1372_p7), %s180_s15, 4096  }
  0x30   : > { %1222 = vsyncadd (%p1372_p7), %s180_s15, 4294963200  ;;  %s204_s25 = sand.u32 1, %s1233_s13   ;;  %p978_p3 = scmp.ne.s32.totalorder %s1253_s18, 0 }
  0x31   : > { %s977_s14 = sshll.u32 %s204_s25, 9 }
  0x32   : > { %s1417_s17 = scalar_lea.vmem [#allocation6], %s977_s14  ;;  %211 = sbr.rel (%p978_p3) target bundleno = 57 (0x39), region = 40 }
  0x37   : > { %vm212_vm0 = vcmask 516096   ;;  %v1274_v0 = vmov 0.0  }
  0x38   : > { %213 = vst.msk [vmem:[#allocation2] sm:$0x1] %vm212_vm0, %v1274_v0 }
  0x39 PF: > { %v214_v1 = vld [vmem:[%s1408_s23] sm:$0xff]  ;;  %v215_v2 = vld [vmem:[%s1408_s23 + $0x8] sm:$0xff]  ;;  %v216_v3 = vld [vmem:[%s1408_s23 + $0x10] sm:$0xff]  ;;  %s979_s20 = sshll.u32 %s1253_s18, 9  ;;  %v1275_v57 = vmov 0   ;;  %vm504_vm1 = vcmask 130112  }
  0x3a   : > { %s247_s4 = sshra.s32 %s979_s20, 7  ;;  %v284_v4 = vadd.f32 %v215_v2, %v214_v1  ;;  %v218_v5 = vld [vmem:[%s1408_s23 + $0x20] sm:$0xff]  ;;  %v219_v6 = vld [vmem:[%s1408_s23 + $0x28] sm:$0xff]  ;;  %v217_v7 = vld [vmem:[%s1408_s23 + $0x18] sm:$0xff]  ;;  %1101 = vset.pattern.permute.xlu2 %v1275_v57  ;;  %1102 = vset.pattern.permute.xlu0 %v1275_v57  ;;  %vm508_vm2 = vcmask 195712   ;;  %vm512_vm3 = vcmask 261312  }
  0x3b   : > { %s980_s8 = sshll.u32 %s247_s4, 3  ;;  %v222_v8 = vld [vmem:[%s1408_s23 + $0x40] sm:$0xff]  ;;  %v289_v10 = vadd.f32 %v219_v6, %v218_v5  ;;  %v223_v11 = vld [vmem:[%s1408_s23 + $0x48] sm:$0xff]  ;;  %v224_v12 = vld [vmem:[%s1408_s23 + $0x50] sm:$0xff]  ;;  %1103 = vset.pattern.permute.xlu1 %v1275_v57  ;;  %vm516_vm4 = vcmask 326912   ;;  %vm520_vm5 = vcmask 392512  }
  0x3c   : > { %s1429_s9 = scalar_lea.vmem %s1417_s17, %s980_s8 [#allocation6]  ;;  %v285_v9 = vadd.f32 %v284_v4, %v216_v3  ;;  %v220_v13 = vld [vmem:[%s1408_s23 + $0x30] sm:$0xff]  ;;  %v294_v14 = vadd.f32 %v223_v11, %v222_v8  ;;  %v226_v15 = vld [vmem:[%s1408_s23 + $0x60] sm:$0xff]  ;;  %v227_v16 = vld [vmem:[%s1408_s23 + $0x68] sm:$0xff]  ;;  %vm524_vm6 = vcmask 458112   ;;  %vm528_vm7 = vcmask 523712   ;;  %p981_p7 = scmp.ne.s32.totalorder %s1253_s18, 1 }
  0x3d   : > { %252 = vst [vmem:[%s1429_s9 + $0x8] sm:$0xff] %v215_v2  ;;  %v225_v18 = vld [vmem:[%s1408_s23 + $0x58] sm:$0xff]  ;;  %v230_v19 = vld [vmem:[%s1408_s23 + $0x80] sm:$0xff]  ;;  %v231_v20 = vld [vmem:[%s1408_s23 + $0x88] sm:$0xff]  ;;  %v299_v22 = vadd.f32 %v227_v16, %v226_v15  ;;  %v290_v26 = vadd.f32 %v289_v10, %v220_v13  ;;  %vm532_vm8 = vcmask 516096  }
  0x3e   : > { %253 = vst [vmem:[%s1429_s9 + $0x10] sm:$0xff] %v216_v3  ;;  %v286_v17 = vadd.f32 %v285_v9, %v217_v7  ;;  %v295_v21 = vadd.f32 %v294_v14, %v224_v12  ;;  %v232_v23 = vld [vmem:[%s1408_s23 + $0x90] sm:$0xff]  ;;  %v304_v24 = vadd.f32 %v231_v20, %v230_v19  ;;  %v234_v25 = vld [vmem:[%s1408_s23 + $0xa0] sm:$0xff]  ;;  %v233_v28 = vld [vmem:[%s1408_s23 + $0x98] sm:$0xff] }
  0x3f   : > { %254 = vst [vmem:[%s1429_s9 + $0x18] sm:$0xff] %v217_v7  ;;  %v228_v27 = vld [vmem:[%s1408_s23 + $0x70] sm:$0xff]  ;;  %v235_v29 = vld [vmem:[%s1408_s23 + $0xa8] sm:$0xff]  ;;  %v221_v30 = vld [vmem:[%s1408_s23 + $0x38] sm:$0xff] }
  0x40   : > { %287 = vadd.xlane.f32.xlu0 %v286_v17  ;;  %251 = vst [vmem:[%s1429_s9] sm:$0xff] %v214_v1  ;;  %v296_v31 = vadd.f32 %v295_v21, %v225_v18  ;;  %v305_v32 = vadd.f32 %v304_v24, %v232_v23  ;;  %v309_v33 = vadd.f32 %v235_v29, %v234_v25  ;;  %v238_v34 = vld [vmem:[%s1408_s23 + $0xc0] sm:$0xff]  ;;  %v239_v35 = vld [vmem:[%s1408_s23 + $0xc8] sm:$0xff]  ;;  %v236_v36 = vld [vmem:[%s1408_s23 + $0xb0] sm:$0xff] }
  0x41   : > { %255 = vst [vmem:[%s1429_s9 + $0x40] sm:$0xff] %v218_v5  ;;  %v300_v37 = vadd.f32 %v299_v22, %v228_v27  ;;  %v291_v39 = vadd.f32 %v290_v26, %v221_v30  ;;  %v229_v40 = vld [vmem:[%s1408_s23 + $0x78] sm:$0xff]  ;;  %v314_v41 = vadd.f32 %v239_v35, %v238_v34  ;;  %v242_v42 = vld [vmem:[%s1408_s23 + $0xe0] sm:$0xff]  ;;  %v243_v43 = vld [vmem:[%s1408_s23 + $0xe8] sm:$0xff] }
  0x42   : > { %256 = vst [vmem:[%s1429_s9 + $0x48] sm:$0xff] %v219_v6  ;;  %297 = vadd.xlane.f32.xlu1 %v296_v31  ;;  %v306_v38 = vadd.f32 %v305_v32, %v233_v28  ;;  %v310_v44 = vadd.f32 %v309_v33, %v236_v36  ;;  %v240_v45 = vld [vmem:[%s1408_s23 + $0xd0] sm:$0xff]  ;;  %v237_v46 = vld [vmem:[%s1408_s23 + $0xb8] sm:$0xff]  ;;  %v319_v48 = vadd.f32 %v243_v43, %v242_v42 }
  0x43   : > { %257 = vst [vmem:[%s1429_s9 + $0x50] sm:$0xff] %v220_v13  ;;  %v301_v47 = vadd.f32 %v300_v37, %v229_v40  ;;  %v315_v49 = vadd.f32 %v314_v41, %v240_v45  ;;  %v244_v50 = vld [vmem:[%s1408_s23 + $0xf0] sm:$0xff]  ;;  %v241_v52 = vld [vmem:[%s1408_s23 + $0xd8] sm:$0xff] }
  0x44   : > { %258 = vst [vmem:[%s1429_s9 + $0x58] sm:$0xff] %v221_v30  ;;  %307 = vadd.xlane.f32.xlu2 %v306_v38  ;;  %v311_v51 = vadd.f32 %v310_v44, %v237_v46  ;;  %v320_v53 = vadd.f32 %v319_v48, %v244_v50  ;;  %v245_v55 = vld [vmem:[%s1408_s23 + $0xf8] sm:$0xff] }
  0x45   : > { %260 = vst [vmem:[%s1429_s9 + $0x88] sm:$0xff] %v223_v11  ;;  %v316_v54 = vadd.f32 %v315_v49, %v241_v52 }
  0x46   : > { %261 = vst [vmem:[%s1429_s9 + $0x90] sm:$0xff] %v224_v12  ;;  %v321_v56 = vadd.f32 %v320_v53, %v245_v55 }
  0x47   : > { %262 = vst [vmem:[%s1429_s9 + $0x98] sm:$0xff] %v225_v18 }
  0x48   : > { %292 = vadd.xlane.f32.xlu0 %v291_v39  ;;  %259 = vst [vmem:[%s1429_s9 + $0x80] sm:$0xff] %v222_v8 }
  0x49   : > { %263 = vst [vmem:[%s1429_s9 + $0xc0] sm:$0xff] %v226_v15 }
  0x4a   : > { %264 = vst [vmem:[%s1429_s9 + $0xc8] sm:$0xff] %v227_v16  ;;  %302 = vadd.xlane.f32.xlu1 %v301_v47 }
  0x4b   : > { %265 = vst [vmem:[%s1429_s9 + $0xd0] sm:$0xff] %v228_v27 }
  0x4c   : > { %266 = vst [vmem:[%s1429_s9 + $0xd8] sm:$0xff] %v229_v40  ;;  %312 = vadd.xlane.f32.xlu2 %v311_v51 }
  0x4d   : > { %268 = vst [vmem:[%s1429_s9 + $0x108] sm:$0xff] %v231_v20 }
  0x4e   : > { %269 = vst [vmem:[%s1429_s9 + $0x110] sm:$0xff] %v232_v23 }
  0x4f   : > { %270 = vst [vmem:[%s1429_s9 + $0x118] sm:$0xff] %v233_v28 }
  0x50   : > { %267 = vst [vmem:[%s1429_s9 + $0x100] sm:$0xff] %v230_v19  ;;  %317 = vadd.xlane.f32.xlu0 %v316_v54 }
  0x51   : > { %271 = vst [vmem:[%s1429_s9 + $0x140] sm:$0xff] %v234_v25 }
  0x52   : > { %272 = vst [vmem:[%s1429_s9 + $0x148] sm:$0xff] %v235_v29  ;;  %322 = vadd.xlane.f32.xlu1 %v321_v56 }
  0x53   : > { %273 = vst [vmem:[%s1429_s9 + $0x150] sm:$0xff] %v236_v36 }
  0x54   : > { %274 = vst [vmem:[%s1429_s9 + $0x158] sm:$0xff] %v237_v46 }
  0x55   : > { %275 = vst [vmem:[%s1429_s9 + $0x180] sm:$0xff] %v238_v34 }
  0x56   : > { %276 = vst [vmem:[%s1429_s9 + $0x188] sm:$0xff] %v239_v35 }
  0x57   : > { %277 = vst [vmem:[%s1429_s9 + $0x190] sm:$0xff] %v240_v45 }
  0x58   : > { %278 = vst [vmem:[%s1429_s9 + $0x198] sm:$0xff] %v241_v52 }
  0x59   : > { %279 = vst [vmem:[%s1429_s9 + $0x1c0] sm:$0xff] %v242_v42 }
  0x5a   : > { %280 = vst [vmem:[%s1429_s9 + $0x1c8] sm:$0xff] %v243_v43 }
  0x5b   : > { %281 = vst [vmem:[%s1429_s9 + $0x1d0] sm:$0xff] %v244_v50 }
  0x5c   : > { %282 = vst [vmem:[%s1429_s9 + $0x1d8] sm:$0xff] %v245_v55 }
  0xb3   : > { %v288_v58 = vpop.xlane.xlu0 %287 }
  0xb4   : > { %v332_v59 = vperm.slane %v288_v58, 0  ;;  %v333_v60 = vperm.slane %v288_v58, 1  ;;  %v334_v61 = vperm.slane %v288_v58, 2  ;;  %v335_v62 = vperm.slane %v288_v58, 3 }
  0xb5   : > { %v336_v63 = vperm.slane %v288_v58, 4  ;;  %v337_v0 = vperm.slane %v288_v58, 5  ;;  %v338_v1 = vperm.slane %v288_v58, 6  ;;  %v339_v2 = vperm.slane %v288_v58, 7  ;;  %v298_v13 = vpop.xlane.xlu1 %297 }
  0xb6   : > { %396 = vst [vmem:[#allocation1] ss:$9 sm:$0xff] %v332_v59  ;;  %v348_v14 = vperm.slane %v298_v13, 0  ;;  %v349_v15 = vperm.slane %v298_v13, 1  ;;  %v350_v16 = vperm.slane %v298_v13, 2  ;;  %v351_v18 = vperm.slane %v298_v13, 3 }
  0xb7   : > { %398 = vst [vmem:[#allocation1 + $0x1] ss:$9 sm:$0xff] %v333_v60  ;;  %v352_v19 = vperm.slane %v298_v13, 4  ;;  %v353_v20 = vperm.slane %v298_v13, 5  ;;  %v354_v21 = vperm.slane %v298_v13, 6  ;;  %v355_v22 = vperm.slane %v298_v13, 7  ;;  %v308_v33 = vpop.xlane.xlu2 %307 }
  0xb8   : > { %400 = vst [vmem:[#allocation1 + $0x2] ss:$9 sm:$0xff] %v334_v61  ;;  %v364_v34 = vperm.slane %v308_v33, 0  ;;  %v365_v35 = vperm.slane %v308_v33, 1  ;;  %v366_v36 = vperm.slane %v308_v33, 2  ;;  %v367_v38 = vperm.slane %v308_v33, 3 }
  0xb9   : > { %402 = vst [vmem:[#allocation1 + $0x3] ss:$9 sm:$0xff] %v335_v62  ;;  %v368_v39 = vperm.slane %v308_v33, 4  ;;  %v369_v40 = vperm.slane %v308_v33, 5  ;;  %v370_v41 = vperm.slane %v308_v33, 6  ;;  %v371_v42 = vperm.slane %v308_v33, 7 }
  0xba   : > { %404 = vst [vmem:[#allocation1 + $0x4] ss:$9 sm:$0xff] %v336_v63 }
  0xbb   : > { %406 = vst [vmem:[#allocation1 + $0x5] ss:$9 sm:$0xff] %v337_v0  ;;  %v293_v3 = vpop.xlane.xlu0 %292 }
  0xbc   : > { %408 = vst [vmem:[#allocation1 + $0x6] ss:$9 sm:$0xff] %v338_v1  ;;  %v340_v4 = vperm.slane %v293_v3, 0  ;;  %v341_v5 = vperm.slane %v293_v3, 1  ;;  %v342_v6 = vperm.slane %v293_v3, 2  ;;  %v343_v8 = vperm.slane %v293_v3, 3 }
  0xbd   : > { %410 = vst [vmem:[#allocation1 + $0x7] ss:$9 sm:$0xff] %v339_v2  ;;  %v344_v9 = vperm.slane %v293_v3, 4  ;;  %v345_v10 = vperm.slane %v293_v3, 5  ;;  %v346_v11 = vperm.slane %v293_v3, 6  ;;  %v347_v12 = vperm.slane %v293_v3, 7  ;;  %v303_v23 = vpop.xlane.xlu1 %302 }
  0xbe   : > { %v356_v24 = vperm.slane %v303_v23, 0  ;;  %v357_v25 = vperm.slane %v303_v23, 1  ;;  %v358_v26 = vperm.slane %v303_v23, 2  ;;  %v359_v28 = vperm.slane %v303_v23, 3 }
  0xbf   : > { %v360_v29 = vperm.slane %v303_v23, 4  ;;  %v361_v30 = vperm.slane %v303_v23, 5  ;;  %v362_v31 = vperm.slane %v303_v23, 6  ;;  %v363_v32 = vperm.slane %v303_v23, 7  ;;  %v313_v43 = vpop.xlane.xlu2 %312 }
  0xc0   : > { %v372_v44 = vperm.slane %v313_v43, 0  ;;  %v373_v45 = vperm.slane %v313_v43, 1  ;;  %v374_v46 = vperm.slane %v313_v43, 2  ;;  %v375_v48 = vperm.slane %v313_v43, 3 }
  0xc1   : > { %v376_v49 = vperm.slane %v313_v43, 4  ;;  %v377_v50 = vperm.slane %v313_v43, 5  ;;  %v378_v51 = vperm.slane %v313_v43, 6  ;;  %v379_v52 = vperm.slane %v313_v43, 7 }
  0xc3   : > { %v318_v53 = vpop.xlane.xlu0 %317 }
  0xc4   : > { %v411_v7 = vld [vmem:[#allocation1] sm:$0xff]  ;;  %v380_v54 = vperm.slane %v318_v53, 0  ;;  %v381_v55 = vperm.slane %v318_v53, 1  ;;  %v382_v56 = vperm.slane %v318_v53, 2  ;;  %v383_v57 = vperm.slane %v318_v53, 3 }
  0xc5   : > { %412 = vst [vmem:[#allocation1] ss:$9 sm:$0xff] %v340_v4  ;;  %476 = vperm.xlu2 %1101, %v411_v7   ;;  %v384_v59 = vperm.slane %v318_v53, 4  ;;  %v385_v60 = vperm.slane %v318_v53, 5  ;;  %v386_v61 = vperm.slane %v318_v53, 6  ;;  %v387_v62 = vperm.slane %v318_v53, 7  ;;  %v323_v63 = vpop.xlane.xlu1 %322 }
  0xc6   : > { %413 = vst [vmem:[#allocation1 + $0x1] ss:$9 sm:$0xff] %v341_v5  ;;  %v388_v0 = vperm.slane %v323_v63, 0  ;;  %v389_v1 = vperm.slane %v323_v63, 1  ;;  %v390_v2 = vperm.slane %v323_v63, 2  ;;  %v391_v3 = vperm.slane %v323_v63, 3 }
  0xc7   : > { %414 = vst [vmem:[#allocation1 + $0x2] ss:$9 sm:$0xff] %v342_v6  ;;  %v392_v5 = vperm.slane %v323_v63, 4  ;;  %v393_v6 = vperm.slane %v323_v63, 5  ;;  %v394_v7 = vperm.slane %v323_v63, 6 }
  0xc8   : > { %415 = vst [vmem:[#allocation1 + $0x3] ss:$9 sm:$0xff] %v343_v8  ;;  %v395_v8 = vperm.slane %v323_v63, 7 }
  0xc9   : > { %416 = vst [vmem:[#allocation1 + $0x4] ss:$9 sm:$0xff] %v344_v9 }
  0xca   : > { %417 = vst [vmem:[#allocation1 + $0x5] ss:$9 sm:$0xff] %v345_v10 }
  0xcb   : > { %418 = vst [vmem:[#allocation1 + $0x6] ss:$9 sm:$0xff] %v346_v11  ;;  %v499_v11 = vlaneseq }
  0xcc   : > { %419 = vst [vmem:[#allocation1 + $0x7] ss:$9 sm:$0xff] %v347_v12 }
  0xcd   : > { %v500_v13 = vand.u32 127, %v499_v11 }
  0xd3   : > { %v420_v17 = vld [vmem:[#allocation1] sm:$0xff] }
  0xd4   : > { %421 = vst [vmem:[#allocation1] ss:$9 sm:$0xff] %v348_v14  ;;  %479 = vperm.xlu0 %1102, %v420_v17   ;;  %v502_v14 = vadd.s32 4294967288, %v500_v13 }
  0xd5   : > { %422 = vst [vmem:[#allocation1 + $0x1] ss:$9 sm:$0xff] %v349_v15 }
  0xd6   : > { %423 = vst [vmem:[#allocation1 + $0x2] ss:$9 sm:$0xff] %v350_v16  ;;  %v506_v16 = vadd.s32 4294967280, %v500_v13 }
  0xd7   : > { %424 = vst [vmem:[#allocation1 + $0x3] ss:$9 sm:$0xff] %v351_v18 }
  0xd8   : > { %425 = vst [vmem:[#allocation1 + $0x4] ss:$9 sm:$0xff] %v352_v19 }
  0xd9   : > { %426 = vst [vmem:[#allocation1 + $0x5] ss:$9 sm:$0xff] %v353_v20 }
  0xda   : > { %427 = vst [vmem:[#allocation1 + $0x6] ss:$9 sm:$0xff] %v354_v21  ;;  %v510_v21 = vadd.s32 4294967272, %v500_v13 }
  0xdb   : > { %428 = vst [vmem:[#allocation1 + $0x7] ss:$9 sm:$0xff] %v355_v22 }
  0xe2   : > { %v429_v27 = vld [vmem:[#allocation1] sm:$0xff] }
  0xe3   : > { %430 = vst [vmem:[#allocation1] ss:$9 sm:$0xff] %v356_v24  ;;  %482 = vperm.xlu1 %1103, %v429_v27   ;;  %v518_v24 = vadd.s32 4294967256, %v500_v13 }
  0xe4   : > { %431 = vst [vmem:[#allocation1 + $0x1] ss:$9 sm:$0xff] %v357_v25  ;;  %v514_v25 = vadd.s32 4294967264, %v500_v13 }
  0xe5   : > { %432 = vst [vmem:[#allocation1 + $0x2] ss:$9 sm:$0xff] %v358_v26 }
  0xe6   : > { %433 = vst [vmem:[#allocation1 + $0x3] ss:$9 sm:$0xff] %v359_v28 }
  0xe7   : > { %434 = vst [vmem:[#allocation1 + $0x4] ss:$9 sm:$0xff] %v360_v29 }
  0xe8   : > { %435 = vst [vmem:[#allocation1 + $0x5] ss:$9 sm:$0xff] %v361_v30 }
  0xe9   : > { %436 = vst [vmem:[#allocation1 + $0x6] ss:$9 sm:$0xff] %v362_v31 }
  0xea   : > { %437 = vst [vmem:[#allocation1 + $0x7] ss:$9 sm:$0xff] %v363_v32  ;;  %v522_v32 = vadd.s32 4294967248, %v500_v13 }
  0xf1   : > { %v438_v37 = vld [vmem:[#allocation1] sm:$0xff] }
  0xf2   : > { %439 = vst [vmem:[#allocation1] ss:$9 sm:$0xff] %v364_v34  ;;  %485 = vperm.xlu2 %1101, %v438_v37   ;;  %v526_v34 = vadd.s32 4294967240, %v500_v13 }
  0xf3   : > { %440 = vst [vmem:[#allocation1 + $0x1] ss:$9 sm:$0xff] %v365_v35 }
  0xf4   : > { %441 = vst [vmem:[#allocation1 + $0x2] ss:$9 sm:$0xff] %v366_v36 }
  0xf5   : > { %442 = vst [vmem:[#allocation1 + $0x3] ss:$9 sm:$0xff] %v367_v38 }
  0xf6   : > { %443 = vst [vmem:[#allocation1 + $0x4] ss:$9 sm:$0xff] %v368_v39  ;;  %v283_v39 = vld [vmem:[#allocation2] sm:$0x1] }
  0xf7   : > { %444 = vst [vmem:[#allocation1 + $0x5] ss:$9 sm:$0xff] %v369_v40 }
  0xf8   : > { %445 = vst [vmem:[#allocation1 + $0x6] ss:$9 sm:$0xff] %v370_v41 }
  0xf9   : > { %446 = vst [vmem:[#allocation1 + $0x7] ss:$9 sm:$0xff] %v371_v42 }
 0x100   : > { %v447_v47 = vld [vmem:[#allocation1] sm:$0xff] }
 0x101   : > { %448 = vst [vmem:[#allocation1] ss:$9 sm:$0xff] %v372_v44  ;;  %488 = vperm.xlu2 %1101, %v447_v47  }
 0x102   : > { %449 = vst [vmem:[#allocation1 + $0x1] ss:$9 sm:$0xff] %v373_v45 }
 0x103   : > { %450 = vst [vmem:[#allocation1 + $0x2] ss:$9 sm:$0xff] %v374_v46 }
 0x104   : > { %451 = vst [vmem:[#allocation1 + $0x3] ss:$9 sm:$0xff] %v375_v48 }
 0x105   : > { %452 = vst [vmem:[#allocation1 + $0x4] ss:$9 sm:$0xff] %v376_v49 }
 0x106   : > { %453 = vst [vmem:[#allocation1 + $0x5] ss:$9 sm:$0xff] %v377_v50 }
 0x107   : > { %454 = vst [vmem:[#allocation1 + $0x6] ss:$9 sm:$0xff] %v378_v51 }
 0x108   : > { %455 = vst [vmem:[#allocation1 + $0x7] ss:$9 sm:$0xff] %v379_v52 }
 0x10f   : > { %v456_v58 = vld [vmem:[#allocation1] sm:$0xff] }
 0x110   : > { %491 = vperm.xlu1 %1103, %v456_v58   ;;  %457 = vst [vmem:[#allocation1] ss:$9 sm:$0xff] %v380_v54 }
 0x111   : > { %458 = vst [vmem:[#allocation1 + $0x1] ss:$9 sm:$0xff] %v381_v55 }
 0x112   : > { %459 = vst [vmem:[#allocation1 + $0x2] ss:$9 sm:$0xff] %v382_v56 }
 0x113   : > { %460 = vst [vmem:[#allocation1 + $0x3] ss:$9 sm:$0xff] %v383_v57 }
 0x114   : > { %461 = vst [vmem:[#allocation1 + $0x4] ss:$9 sm:$0xff] %v384_v59 }
 0x115   : > { %462 = vst [vmem:[#allocation1 + $0x5] ss:$9 sm:$0xff] %v385_v60 }
 0x116   : > { %463 = vst [vmem:[#allocation1 + $0x6] ss:$9 sm:$0xff] %v386_v61 }
 0x117   : > { %464 = vst [vmem:[#allocation1 + $0x7] ss:$9 sm:$0xff] %v387_v62 }
 0x11e   : > { %v465_v4 = vld [vmem:[#allocation1] sm:$0xff] }
 0x11f   : > { %494 = vperm.xlu2 %1101, %v465_v4   ;;  %466 = vst [vmem:[#allocation1] ss:$9 sm:$0xff] %v388_v0  ;;  %v477_v10 = vpop.permute.xlu2 %476 }
 0x120   : > { %467 = vst [vmem:[#allocation1 + $0x1] ss:$9 sm:$0xff] %v389_v1  ;;  %v501_v20 = vperm.slane %v477_v10, %v500_v13 }
 0x121   : > { %468 = vst [vmem:[#allocation1 + $0x2] ss:$9 sm:$0xff] %v390_v2 }
 0x122   : > { %469 = vst [vmem:[#allocation1 + $0x3] ss:$9 sm:$0xff] %v391_v3 }
 0x123   : > { %470 = vst [vmem:[#allocation1 + $0x4] ss:$9 sm:$0xff] %v392_v5 }
 0x124   : > { %471 = vst [vmem:[#allocation1 + $0x5] ss:$9 sm:$0xff] %v393_v6 }
 0x125   : > { %472 = vst [vmem:[#allocation1 + $0x6] ss:$9 sm:$0xff] %v394_v7 }
 0x126   : > { %473 = vst [vmem:[#allocation1 + $0x7] ss:$9 sm:$0xff] %v395_v8 }
 0x12d   : > { %v474_v9 = vld [vmem:[#allocation1] sm:$0xff] }
 0x12e   : > { %497 = vperm.xlu1 %1103, %v474_v9  }
 0x146   : > { %v480_v15 = vpop.permute.xlu0 %479 }
 0x147   : > { %v503_v18 = vperm.slane %v480_v15, %v502_v14 }
 0x149   : > { %v505_v23 = vsel %vm504_vm1, %v503_v18, %v501_v20 }
 0x14c   : > { %v486_v12 = vpop.permute.xlu2 %485 }
 0x14d   : > { %v511_v28 = vperm.slane %v486_v12, %v510_v21 }
 0x155   : > { %v483_v17 = vpop.permute.xlu1 %482 }
 0x156   : > { %v507_v19 = vperm.slane %v483_v17, %v506_v16 }
 0x158   : > { %v509_v26 = vsel %vm508_vm2, %v507_v19, %v505_v23 }
 0x159   : > { %v513_v29 = vsel %vm512_vm3, %v511_v28, %v509_v26 }
 0x15b   : > { %v489_v22 = vpop.permute.xlu2 %488 }
 0x15c   : > { %v515_v31 = vperm.slane %v489_v22, %v514_v25 }
 0x15e   : > { %v517_v35 = vsel %vm516_vm4, %v515_v31, %v513_v29 }
 0x179   : > { %v495_v33 = vpop.permute.xlu2 %494 }
 0x17a   : > { %v523_v37 = vperm.slane %v495_v33, %v522_v32 }
 0x182   : > { %v492_v27 = vpop.permute.xlu1 %491 }
 0x183   : > { %v519_v30 = vperm.slane %v492_v27, %v518_v24 }
 0x185   : > { %v521_v36 = vsel %vm520_vm5, %v519_v30, %v517_v35 }
 0x186   : > { %v525_v41 = vsel %vm524_vm6, %v523_v37, %v521_v36 }
 0x1a0   : > { %v498_v38 = vpop.permute.xlu1 %497 }
 0x1a1   : > { %v527_v40 = vperm.slane %v498_v38, %v526_v34 }
 0x1a2   : > { %537 = sbr.rel (%p981_p7) target bundleno = 888 (0x378), region = 44 }
 0x1a3   : > { %v529_v42 = vsel %vm528_vm7, %v527_v40, %v525_v41 }
 0x1a4   : > { %v531_v43 = vadd.f32 %v529_v42, %v283_v39 }
 0x1a6   : > { %533 = vst.msk [vmem:[#allocation2] sm:$0x1] %vm532_vm8, %v531_v43 }
 0x1a7   : > { %v547_v44 = vld [vmem:[%s1701_s1 + $0x38] sm:$0xff]  ;;  %v546_v45 = vld [vmem:[%s1701_s1 + $0x30] sm:$0xff]  ;;  %v545_v46 = vld [vmem:[%s1701_s1 + $0x28] sm:$0xff]  ;;  %vm548_vm9 = vcmask 523264   ;;  %vm578_vm10 = vcmask 1043456   ;;  %vm574_vm11 = vcmask 31744  }
 0x1a8   : > { %560 = vmatpush.msra.mxu0 %v547_v44  ;;  %v544_v47 = vld [vmem:[%s1701_s1 + $0x20] sm:$0xff]  ;;  %v543_v48 = vld [vmem:[%s1701_s1 + $0x18] sm:$0xff]  ;;  %v542_v49 = vld [vmem:[%s1701_s1 + $0x10] sm:$0xff]  ;;  %v623_v57 = vshrl.u32 %v499_v11, 7 }
 0x1a9   : > { %v541_v51 = vld [vmem:[%s1701_s1 + $0x8] sm:$0xff]  ;;  %v540_v52 = vld [vmem:[%s1701_s1] sm:$0xff]  ;;  %v703_v17 = vld [vmem:[%s1417_s17 + $0x108] sm:$0xff] }
 0x1aa   : > { %561 = vmatpush.msra.mxu0 %v546_v45  ;;  %v573_v54 = vld [vmem:[%s1702_s2] sm:$0xf]  ;;  %1104 = vset.pattern.permute.xlu0 %v623_v57  ;;  %v648_v58 = vadd.s32 32, %v623_v57  ;;  %v636_v59 = vadd.s32 16, %v623_v57  ;;  %v654_v11 = vadd.s32 40, %v623_v57  ;;  %v642_v12 = vadd.s32 24, %v623_v57 }
 0x1ab   : > { %983 = vmatpush.msk.msra.mxu1 %vm578_vm10, %v573_v54  ;;  %v630_v13 = vadd.s32 8, %v623_v57  ;;  %v666_v14 = vadd.s32 56, %v623_v57  ;;  %v660_v15 = vadd.s32 48, %v623_v57  ;;  %v702_v16 = vld [vmem:[%s1417_s17 + $0x100] sm:$0xff]  ;;  %v704_v18 = vld [vmem:[%s1417_s17 + $0x110] sm:$0xff]  ;;  %v705_v19 = vld [vmem:[%s1417_s17 + $0x118] sm:$0xff] }
 0x1ac   : > { %562 = vmatpush.msra.mxu0 %v545_v46  ;;  %1108 = vset.pattern.permute.xlu2 %v648_v58  ;;  %v706_v20 = vld [vmem:[%s1417_s17 + $0x120] sm:$0xff]  ;;  %v707_v22 = vld [vmem:[%s1417_s17 + $0x128] sm:$0xff]  ;;  %v708_v26 = vld [vmem:[%s1417_s17 + $0x130] sm:$0xff] }
 0x1ad   : > { %v538_v50 = vld [vmem:[#allocation2] sm:$0x1]  ;;  %1106 = vset.pattern.permute.xlu1 %v636_v59  ;;  %v710_v33 = vld [vmem:[%s1417_s17 + $0x140] sm:$0xff]  ;;  %v711_v34 = vld [vmem:[%s1417_s17 + $0x148] sm:$0xff] }
 0x1ae   : > { %563 = vmatpush.msra.mxu0 %v544_v47  ;;  %v539_v53 = vmul.f32 0.0009765625, %v538_v50  ;;  %v709_v28 = vld [vmem:[%s1417_s17 + $0x138] sm:$0xff]  ;;  %v712_v35 = vld [vmem:[%s1417_s17 + $0x150] sm:$0xff]  ;;  %v714_v37 = vld [vmem:[%s1417_s17 + $0x160] sm:$0xff] }
 0x1af   : > { %v713_v36 = vld [vmem:[%s1417_s17 + $0x158] sm:$0xff]  ;;  %v715_v39 = vld [vmem:[%s1417_s17 + $0x168] sm:$0xff]  ;;  %v716_v43 = vld [vmem:[%s1417_s17 + $0x170] sm:$0xff] }
 0x1b0   : > { %564 = vmatpush.msra.mxu0 %v543_v48  ;;  %v717_v45 = vld [vmem:[%s1417_s17 + $0x178] sm:$0xff]  ;;  %v686_v50 = vld [vmem:[%s1417_s17 + $0x80] sm:$0xff] }
 0x1b1   : > { %v690_v54 = vld [vmem:[%s1417_s17 + $0xa0] sm:$0xff] }
 0x1b2   : > { %565 = vmatpush.msra.mxu0 %v542_v49 }
 0x1b4   : > { %566 = vmatpush.msra.mxu0 %v541_v51  ;;  %v687_v51 = vld [vmem:[%s1417_s17 + $0x88] sm:$0xff] }
 0x1b6   : > { %567 = vmatpush.msra.mxu0 %v540_v52  ;;  %v688_v52 = vld [vmem:[%s1417_s17 + $0x90] sm:$0xff] }
 0x1b7   : > { %982 = vmatmul.msk.f32.vlgmr.msra.gmra.mxu0 %vm548_vm9, %v539_v53  ;;  %v689_v53 = vld [vmem:[%s1417_s17 + $0x98] sm:$0xff] }
 0x234   : > { %v569_v55 = vpop.f32.mrf.mxu0 }
 0x235   : > { %v572_v56 = vmax.f32 %v569_v55, 0.0 }
 0x237   : > { %984 = vmatmul.msk.f32.vlgmr.msra.gmra.mxu1 %vm574_vm11, %v572_v56  ;;  %v691_v56 = vld [vmem:[%s1417_s17 + $0xa8] sm:$0xff] }
 0x2b4   : > { %v599_v60 = vpop.f32.mrf.mxu1 }
 0x2b5   : > { %v985_v61 = vmul.f32 -1.442695, %v599_v60  ;;  %v692_v60 = vld [vmem:[%s1417_s17 + $0xb0] sm:$0xff] }
 0x2b7   : > { %1113 = vpow2.f32 %v985_v61 }
 0x2bd   : > { %v1114_v62 = vpop.eup %1113 }
 0x2be   : > { %v605_v63 = vadd.f32 1.0, %v1114_v62  ;;  %v693_v62 = vld [vmem:[%s1417_s17 + $0xb8] sm:$0xff] }
 0x2c0   : > { %1115 = vrcp.f32 %v605_v63  ;;  %v617_v3 = vand.u32 2147483648, %v605_v63  ;;  %v615_v5 = vand.u32 2147483647, %v605_v63  ;;  %vm611_vm13 = vweird.f32 %v605_v63 }
 0x2c2   : > { %v618_v7 = vor.u32 1.1754944e-38, %v617_v3  ;;  %vm616_vm15 = vcmp.eq.f32.partialorder %v615_v5, 8.507059e+37 }
 0x2c6   : > { %v1116_v0 = vpop.eup %1115 }
 0x2c7   : > { %v607_v1 = vmul.f32 %v1116_v0, %v605_v63  ;;  %vm612_vm12 = vweird.f32 %v1116_v0 }
 0x2c8   : > { %vm613_vm14 = vmor %vm611_vm13, %vm612_vm12 }
 0x2c9   : > { %v608_v2 = vsub.f32 1.0, %v607_v1  ;;  %v670_v1 = vld [vmem:[%s1417_s17] sm:$0xff] }
 0x2cb   : > { %v609_v4 = vmul.f32 %v1116_v0, %v608_v2 }
 0x2cd   : > { %v610_v6 = vadd.f32 %v1116_v0, %v609_v4  ;;  %v671_v4 = vld [vmem:[%s1417_s17 + $0x8] sm:$0xff] }
 0x2cf   : > { %v614_v8 = vsel %vm613_vm14, %v1116_v0, %v610_v6  ;;  %v672_v6 = vld [vmem:[%s1417_s17 + $0x10] sm:$0xff] }
 0x2d0   : > { %v619_v9 = vsel %vm616_vm15, %v618_v7, %v614_v8  ;;  %v673_v7 = vld [vmem:[%s1417_s17 + $0x18] sm:$0xff] }
 0x2d1   : > { %v621_v10 = vperm.slane %v619_v9, 0  ;;  %v674_v9 = vld [vmem:[%s1417_s17 + $0x20] sm:$0xff] }
 0x2d3   : > { %650 = vperm.xlu2 %1108, %v621_v10   ;;  %638 = vperm.xlu1 %1106, %v621_v10  }
 0x2d4   : > { %626 = vperm.xlu0 %1104, %v621_v10  }
 0x2db   : > { %1109 = vset.pattern.permute.xlu2 %v654_v11  ;;  %1107 = vset.pattern.permute.xlu1 %v642_v12  ;;  %v675_v11 = vld [vmem:[%s1417_s17 + $0x28] sm:$0xff] }
 0x2dc   : > { %1105 = vset.pattern.permute.xlu0 %v630_v13  ;;  %v676_v13 = vld [vmem:[%s1417_s17 + $0x30] sm:$0xff] }
 0x2e3   : > { %656 = vperm.xlu2 %1109, %v621_v10   ;;  %644 = vperm.xlu1 %1107, %v621_v10  }
 0x2e4   : > { %632 = vperm.xlu0 %1105, %v621_v10  }
 0x2eb   : > { %1111 = vset.pattern.permute.xlu2 %v666_v14  ;;  %1110 = vset.pattern.permute.xlu1 %v660_v15  ;;  %v677_v15 = vld [vmem:[%s1417_s17 + $0x38] sm:$0xff] }
 0x2ec   : > { %1112 = vset.pattern.permute.xlu0 %v666_v14 }
 0x2f3   : > { %668 = vperm.xlu2 %1111, %v621_v10   ;;  %662 = vperm.xlu1 %1110, %v621_v10  }
 0x32d   : > { %v651_v21 = vpop.permute.xlu2 %650 }
 0x32e   : > { %v766_v23 = vmul.f32 %v702_v16, %v651_v21  ;;  %v767_v24 = vmul.f32 %v703_v17, %v651_v21  ;;  %v768_v25 = vmul.f32 %v704_v18, %v651_v21  ;;  %v769_v27 = vmul.f32 %v705_v19, %v651_v21  ;;  %v726_v18 = vld [vmem:[%s1417_s17 + $0x1c0] sm:$0xff] }
 0x32f   : > { %v770_v29 = vmul.f32 %v706_v20, %v651_v21  ;;  %v771_v30 = vmul.f32 %v707_v22, %v651_v21  ;;  %v772_v31 = vmul.f32 %v708_v26, %v651_v21  ;;  %v773_v32 = vmul.f32 %v709_v28, %v651_v21  ;;  %v727_v21 = vld [vmem:[%s1417_s17 + $0x1c8] sm:$0xff]  ;;  %v730_v26 = vld [vmem:[%s1417_s17 + $0x1e0] sm:$0xff] }
 0x330   : > { %830 = vst [vmem:[%s1417_s17 + $0x100] sm:$0xff] %v766_v23  ;;  %v728_v23 = vld [vmem:[%s1417_s17 + $0x1d0] sm:$0xff]  ;;  %v731_v28 = vld [vmem:[%s1417_s17 + $0x1e8] sm:$0xff] }
 0x331   : > { %831 = vst [vmem:[%s1417_s17 + $0x108] sm:$0xff] %v767_v24  ;;  %v729_v24 = vld [vmem:[%s1417_s17 + $0x1d8] sm:$0xff] }
 0x332   : > { %832 = vst [vmem:[%s1417_s17 + $0x110] sm:$0xff] %v768_v25 }
 0x333   : > { %833 = vst [vmem:[%s1417_s17 + $0x118] sm:$0xff] %v769_v27 }
 0x334   : > { %834 = vst [vmem:[%s1417_s17 + $0x120] sm:$0xff] %v770_v29 }
 0x335   : > { %835 = vst [vmem:[%s1417_s17 + $0x128] sm:$0xff] %v771_v30  ;;  %v732_v30 = vld [vmem:[%s1417_s17 + $0x1f0] sm:$0xff] }
 0x336   : > { %836 = vst [vmem:[%s1417_s17 + $0x130] sm:$0xff] %v772_v31 }
 0x337   : > { %837 = vst [vmem:[%s1417_s17 + $0x138] sm:$0xff] %v773_v32  ;;  %v733_v32 = vld [vmem:[%s1417_s17 + $0x1f8] sm:$0xff] }
 0x33d   : > { %v657_v38 = vpop.permute.xlu2 %656 }
 0x33e   : > { %v774_v40 = vmul.f32 %v710_v33, %v657_v38  ;;  %v775_v41 = vmul.f32 %v711_v34, %v657_v38  ;;  %v776_v42 = vmul.f32 %v712_v35, %v657_v38  ;;  %v777_v44 = vmul.f32 %v713_v36, %v657_v38  ;;  %v694_v35 = vld [vmem:[%s1417_s17 + $0xc0] sm:$0xff] }
 0x33f   : > { %v778_v46 = vmul.f32 %v714_v37, %v657_v38  ;;  %v779_v47 = vmul.f32 %v715_v39, %v657_v38  ;;  %v780_v48 = vmul.f32 %v716_v43, %v657_v38  ;;  %v781_v49 = vmul.f32 %v717_v45, %v657_v38  ;;  %v695_v38 = vld [vmem:[%s1417_s17 + $0xc8] sm:$0xff]  ;;  %v698_v43 = vld [vmem:[%s1417_s17 + $0xe0] sm:$0xff] }
 0x340   : > { %838 = vst [vmem:[%s1417_s17 + $0x140] sm:$0xff] %v774_v40  ;;  %v696_v40 = vld [vmem:[%s1417_s17 + $0xd0] sm:$0xff]  ;;  %v699_v45 = vld [vmem:[%s1417_s17 + $0xe8] sm:$0xff] }
 0x341   : > { %839 = vst [vmem:[%s1417_s17 + $0x148] sm:$0xff] %v775_v41  ;;  %v697_v41 = vld [vmem:[%s1417_s17 + $0xd8] sm:$0xff] }
 0x342   : > { %840 = vst [vmem:[%s1417_s17 + $0x150] sm:$0xff] %v776_v42 }
 0x343   : > { %841 = vst [vmem:[%s1417_s17 + $0x158] sm:$0xff] %v777_v44 }
 0x344   : > { %842 = vst [vmem:[%s1417_s17 + $0x160] sm:$0xff] %v778_v46 }
 0x345   : > { %843 = vst [vmem:[%s1417_s17 + $0x168] sm:$0xff] %v779_v47  ;;  %v639_v55 = vpop.permute.xlu1 %638  ;;  %v700_v47 = vld [vmem:[%s1417_s17 + $0xf0] sm:$0xff] }
 0x346   : > { %844 = vst [vmem:[%s1417_s17 + $0x170] sm:$0xff] %v780_v48  ;;  %v750_v57 = vmul.f32 %v686_v50, %v639_v55  ;;  %v751_v58 = vmul.f32 %v687_v51, %v639_v55  ;;  %v752_v59 = vmul.f32 %v688_v52, %v639_v55  ;;  %v753_v61 = vmul.f32 %v689_v53, %v639_v55  ;;  %v627_v2 = vpop.permute.xlu0 %626  ;;  %v678_v52 = vld [vmem:[%s1417_s17 + $0x40] sm:$0xff] }
 0x347   : > { %845 = vst [vmem:[%s1417_s17 + $0x178] sm:$0xff] %v781_v49  ;;  %v754_v63 = vmul.f32 %v690_v54, %v639_v55  ;;  %v755_v0 = vmul.f32 %v691_v56, %v639_v55  ;;  %v756_v3 = vmul.f32 %v692_v60, %v639_v55  ;;  %v757_v5 = vmul.f32 %v693_v62, %v639_v55  ;;  %v701_v49 = vld [vmem:[%s1417_s17 + $0xf8] sm:$0xff]  ;;  %v679_v55 = vld [vmem:[%s1417_s17 + $0x48] sm:$0xff]  ;;  %v682_v60 = vld [vmem:[%s1417_s17 + $0x60] sm:$0xff] }
 0x348   : > { %814 = vst [vmem:[%s1417_s17 + $0x80] sm:$0xff] %v750_v57  ;;  %v734_v8 = vmul.f32 %v670_v1, %v627_v2  ;;  %v735_v10 = vmul.f32 %v671_v4, %v627_v2  ;;  %v736_v12 = vmul.f32 %v672_v6, %v627_v2  ;;  %v737_v14 = vmul.f32 %v673_v7, %v627_v2  ;;  %v680_v57 = vld [vmem:[%s1417_s17 + $0x50] sm:$0xff]  ;;  %v683_v62 = vld [vmem:[%s1417_s17 + $0x68] sm:$0xff] }
 0x349   : > { %815 = vst [vmem:[%s1417_s17 + $0x88] sm:$0xff] %v751_v58  ;;  %v738_v16 = vmul.f32 %v674_v9, %v627_v2  ;;  %v739_v17 = vmul.f32 %v675_v11, %v627_v2  ;;  %v740_v20 = vmul.f32 %v676_v13, %v627_v2  ;;  %v741_v22 = vmul.f32 %v677_v15, %v627_v2  ;;  %v681_v58 = vld [vmem:[%s1417_s17 + $0x58] sm:$0xff]  ;;  %v722_v13 = vld [vmem:[%s1417_s17 + $0x1a0] sm:$0xff]  ;;  %v723_v15 = vld [vmem:[%s1417_s17 + $0x1a8] sm:$0xff] }
 0x34a   : > { %816 = vst [vmem:[%s1417_s17 + $0x90] sm:$0xff] %v752_v59  ;;  %v685_v2 = vld [vmem:[%s1417_s17 + $0x78] sm:$0xff] }
 0x34b   : > { %817 = vst [vmem:[%s1417_s17 + $0x98] sm:$0xff] %v753_v61  ;;  %v721_v11 = vld [vmem:[%s1417_s17 + $0x198] sm:$0xff] }
 0x34c   : > { %818 = vst [vmem:[%s1417_s17 + $0xa0] sm:$0xff] %v754_v63 }
 0x34d   : > { %819 = vst [vmem:[%s1417_s17 + $0xa8] sm:$0xff] %v755_v0  ;;  %v669_v19 = vpop.permute.xlu2 %668  ;;  %v684_v0 = vld [vmem:[%s1417_s17 + $0x70] sm:$0xff] }
 0x34e   : > { %820 = vst [vmem:[%s1417_s17 + $0xb0] sm:$0xff] %v756_v3  ;;  %v790_v25 = vmul.f32 %v726_v18, %v669_v19  ;;  %v791_v27 = vmul.f32 %v727_v21, %v669_v19  ;;  %v792_v29 = vmul.f32 %v728_v23, %v669_v19  ;;  %v793_v31 = vmul.f32 %v729_v24, %v669_v19 }
 0x34f   : > { %821 = vst [vmem:[%s1417_s17 + $0xb8] sm:$0xff] %v757_v5  ;;  %v794_v33 = vmul.f32 %v730_v26, %v669_v19  ;;  %v795_v34 = vmul.f32 %v731_v28, %v669_v19  ;;  %v796_v37 = vmul.f32 %v732_v30, %v669_v19  ;;  %v797_v39 = vmul.f32 %v733_v32, %v669_v19  ;;  %v718_v5 = vld [vmem:[%s1417_s17 + $0x180] sm:$0xff]  ;;  %v725_v19 = vld [vmem:[%s1417_s17 + $0x1b8] sm:$0xff] }
 0x350   : > { %798 = vst [vmem:[%s1417_s17] sm:$0xff] %v734_v8  ;;  %v719_v8 = vld [vmem:[%s1417_s17 + $0x188] sm:$0xff] }
 0x351   : > { %799 = vst [vmem:[%s1417_s17 + $0x8] sm:$0xff] %v735_v10  ;;  %v720_v10 = vld [vmem:[%s1417_s17 + $0x190] sm:$0xff] }
 0x352   : > { %800 = vst [vmem:[%s1417_s17 + $0x10] sm:$0xff] %v736_v12 }
 0x353   : > { %801 = vst [vmem:[%s1417_s17 + $0x18] sm:$0xff] %v737_v14 }
 0x354   : > { %802 = vst [vmem:[%s1417_s17 + $0x20] sm:$0xff] %v738_v16 }
 0x355   : > { %803 = vst [vmem:[%s1417_s17 + $0x28] sm:$0xff] %v739_v17  ;;  %v645_v36 = vpop.permute.xlu1 %644  ;;  %v724_v17 = vld [vmem:[%s1417_s17 + $0x1b0] sm:$0xff] }
 0x356   : > { %804 = vst [vmem:[%s1417_s17 + $0x30] sm:$0xff] %v740_v20  ;;  %v758_v42 = vmul.f32 %v694_v35, %v645_v36  ;;  %v759_v44 = vmul.f32 %v695_v38, %v645_v36  ;;  %v760_v46 = vmul.f32 %v696_v40, %v645_v36  ;;  %v761_v48 = vmul.f32 %v697_v41, %v645_v36  ;;  %v633_v53 = vpop.permute.xlu0 %632 }
 0x357   : > { %805 = vst [vmem:[%s1417_s17 + $0x38] sm:$0xff] %v741_v22  ;;  %v762_v50 = vmul.f32 %v698_v43, %v645_v36  ;;  %v763_v51 = vmul.f32 %v699_v45, %v645_v36  ;;  %v764_v54 = vmul.f32 %v700_v47, %v645_v36  ;;  %v765_v56 = vmul.f32 %v701_v49, %v645_v36 }
 0x358   : > { %854 = vst [vmem:[%s1417_s17 + $0x1c0] sm:$0xff] %v790_v25  ;;  %v742_v59 = vmul.f32 %v678_v52, %v633_v53  ;;  %v743_v61 = vmul.f32 %v679_v55, %v633_v53  ;;  %v744_v63 = vmul.f32 %v680_v57, %v633_v53  ;;  %v745_v1 = vmul.f32 %v681_v58, %v633_v53 }
 0x359   : > { %855 = vst [vmem:[%s1417_s17 + $0x1c8] sm:$0xff] %v791_v27  ;;  %v746_v3 = vmul.f32 %v682_v60, %v633_v53  ;;  %v747_v4 = vmul.f32 %v683_v62, %v633_v53  ;;  %v748_v7 = vmul.f32 %v684_v0, %v633_v53  ;;  %v749_v9 = vmul.f32 %v685_v2, %v633_v53 }
 0x35a   : > { %856 = vst [vmem:[%s1417_s17 + $0x1d0] sm:$0xff] %v792_v29 }
 0x35b   : > { %857 = vst [vmem:[%s1417_s17 + $0x1d8] sm:$0xff] %v793_v31 }
 0x35c   : > { %858 = vst [vmem:[%s1417_s17 + $0x1e0] sm:$0xff] %v794_v33 }
 0x35d   : > { %859 = vst [vmem:[%s1417_s17 + $0x1e8] sm:$0xff] %v795_v34 }
 0x35e   : > { %860 = vst [vmem:[%s1417_s17 + $0x1f0] sm:$0xff] %v796_v37 }
 0x35f   : > { %861 = vst [vmem:[%s1417_s17 + $0x1f8] sm:$0xff] %v797_v39 }
 0x360   : > { %822 = vst [vmem:[%s1417_s17 + $0xc0] sm:$0xff] %v758_v42 }
 0x361   : > { %823 = vst [vmem:[%s1417_s17 + $0xc8] sm:$0xff] %v759_v44 }
 0x362   : > { %824 = vst [vmem:[%s1417_s17 + $0xd0] sm:$0xff] %v760_v46 }
 0x363   : > { %825 = vst [vmem:[%s1417_s17 + $0xd8] sm:$0xff] %v761_v48 }
 0x364   : > { %826 = vst [vmem:[%s1417_s17 + $0xe0] sm:$0xff] %v762_v50 }
 0x365   : > { %827 = vst [vmem:[%s1417_s17 + $0xe8] sm:$0xff] %v763_v51  ;;  %v663_v6 = vpop.permute.xlu1 %662 }
 0x366   : > { %828 = vst [vmem:[%s1417_s17 + $0xf0] sm:$0xff] %v764_v54  ;;  %v782_v12 = vmul.f32 %v718_v5, %v663_v6  ;;  %v783_v14 = vmul.f32 %v719_v8, %v663_v6  ;;  %v784_v16 = vmul.f32 %v720_v10, %v663_v6  ;;  %v785_v18 = vmul.f32 %v721_v11, %v663_v6 }
 0x367   : > { %829 = vst [vmem:[%s1417_s17 + $0xf8] sm:$0xff] %v765_v56  ;;  %v786_v20 = vmul.f32 %v722_v13, %v663_v6  ;;  %v787_v21 = vmul.f32 %v723_v15, %v663_v6  ;;  %v788_v22 = vmul.f32 %v724_v17, %v663_v6  ;;  %v789_v23 = vmul.f32 %v725_v19, %v663_v6 }
 0x368   : > { %806 = vst [vmem:[%s1417_s17 + $0x40] sm:$0xff] %v742_v59 }
 0x369   : > { %807 = vst [vmem:[%s1417_s17 + $0x48] sm:$0xff] %v743_v61 }
 0x36a   : > { %808 = vst [vmem:[%s1417_s17 + $0x50] sm:$0xff] %v744_v63 }
 0x36b   : > { %809 = vst [vmem:[%s1417_s17 + $0x58] sm:$0xff] %v745_v1 }
 0x36c   : > { %810 = vst [vmem:[%s1417_s17 + $0x60] sm:$0xff] %v746_v3 }
 0x36d   : > { %811 = vst [vmem:[%s1417_s17 + $0x68] sm:$0xff] %v747_v4 }
 0x36e   : > { %812 = vst [vmem:[%s1417_s17 + $0x70] sm:$0xff] %v748_v7 }
 0x36f   : > { %813 = vst [vmem:[%s1417_s17 + $0x78] sm:$0xff] %v749_v9 }
 0x370   : > { %846 = vst [vmem:[%s1417_s17 + $0x180] sm:$0xff] %v782_v12 }
 0x371   : > { %847 = vst [vmem:[%s1417_s17 + $0x188] sm:$0xff] %v783_v14 }
 0x372   : > { %848 = vst [vmem:[%s1417_s17 + $0x190] sm:$0xff] %v784_v16 }
 0x373   : > { %849 = vst [vmem:[%s1417_s17 + $0x198] sm:$0xff] %v785_v18 }
 0x374   : > { %850 = vst [vmem:[%s1417_s17 + $0x1a0] sm:$0xff] %v786_v20 }
 0x375   : > { %851 = vst [vmem:[%s1417_s17 + $0x1a8] sm:$0xff] %v787_v21 }
 0x376   : > { %852 = vst [vmem:[%s1417_s17 + $0x1b0] sm:$0xff] %v788_v22 }
 0x377   : > { %853 = vst [vmem:[%s1417_s17 + $0x1b8] sm:$0xff] %v789_v23 }
 0x378 PF: > { %s991_s28 = sshll.u32 %s1257_s19, 9  ;;  %s875_s27 = sshll.u32 %s1417_s17, 4  ;;  %s876_s27 = int_to_ptr.vmem [resolvable:$true] %s875_s27 }
 0x379   : > { %s874_s30 = scalar_lea.hbm %s1703_s3, %s991_s28  ;;  %s863_s26 = scalar_lea.sflag [#allocation5], %s204_s25 }
 0x37a   : > { %s877_s24 = sshll.u32 %s874_s30, 4  ;;  %s1167_s19 = scalar_lea.hbm %s1703_s3, 2048  ;;  %s878_s24 = int_to_ptr.hbm [resolvable:$true] %s877_s24 }
 0x37b   : > { %s1161_s18 = sshra.s32 %s878_s24, 4  ;;  %s1162_s18 = int_to_ptr.hbm [resolvable:$true] %s1161_s18 }
 0x37c   : > { %s1163_s29 = scalar_lea.hbm %s1162_s18, 512  ;;  %p1168_p13 = scmp.lt.s32.totalorder %s1162_s18, %s1703_s3 }
 0x37d   : > { %p1164_p9 = scmp.ne.s32.totalorder %s1162_s18, %s1163_s29  ;;  %p1169_p0 = scmp.lt.s32.totalorder %s1167_s19, %s1163_s29 }
 0x37f   : > { %p1165_p10 = pnand %p1164_p9, %p1380_p12  ;;  %p1170_p1 = por %p1169_p0, %p1168_p13 }
 0x381   : > { %p1166_p11 = pneg %p1165_p10 }
 0x383   : > { %p1171_p4 = pnand %p1170_p1, %p1166_p11 }
 0x385   : > { %1174 = shalt.err (!%p1171_p4)
}
 0x386   : > { %s1276_s25 = smov 1024   ;;  %s1277_s17 = smov 64  }
 0x387   : > { %994 = dma.vmem_to_hbm [thread:$0]  (%p1380_p12), %s876_s27, 8192, %s878_s24, %s863_s26, %s1276_s25, %s1276_s25, %s1277_s17  }
 0x388 PF: > { %p1005_p5 = scmp.ge.s32.totalorder %s1269_s22, 2  ;;  %s892_s4 = sand.u32 1, %s1229_s12  }
 0x389   : > { %s893_s8 = scalar_lea.sflag [#allocation5], %s892_s4 }
 0x38a   : > { %p1001_p6 = pnand %p1005_p5, %p1393_p2 }
 0x38c   : > { %p1002_p8 = pneg %p1001_p6 }
 0x38e   : > { %1224 = dma.done.wait (%p1002_p8), %s893_s8, 8192  }
 0x38f   : > { %1226 = vsyncadd (%p1002_p8), %s893_s8, 4294959104  ;;  %s19_s22 = sadd.s32 1, %s1269_s22   ;;  %s1720_s9 = sld [smem:[#allocation9_spill]] }
 0x390   : > { %p16_p3 = scmp.ge.s32.totalorder %s19_s22, 10   ;;  %s1721_s14 = sld [smem:[#allocation14_spill]] }
 0x391   : > { %s1722_s7 = sld [smem:[#allocation10_spill]]  ;;  %s1727_s12 = smov %s1233_s13 }
 0x392   : > { %s1723_s17 = sld [smem:[#allocation15_spill]]  ;;  %s1729_s15 = smov %s1245_s16 }
 0x393   : > { %s1724_s18 = sld [smem:[#allocation11_spill]]  ;;  %s1731_s19 = smov %s1265_s21 }
 0x394   : > { %s1725_s20 = sld [smem:[#allocation12_spill]] }
 0x395   : > { %s1726_s11 = sld [smem:[#allocation13_spill]]  ;;  %s1728_s13 = smov %s1720_s9 }
 0x397   : > { %s1730_s16 = smov %s1722_s7  ;;  %18 = sbr.rel (!%p16_p3) target bundleno = 9 (0x9), region = 93 }
 0x39b   : > { %s1732_s21 = smov %s1726_s11 }
 0x39c   :  { %899 = vsyncpa [#allocation4], 1 }
 0x39d   :  { %901 = vsyncpa [#allocation4 + $0x1], 1 }
 0x39e   :  { %902 = vsyncpa [#allocation5], 1 }
 0x39f   :  { %904 = vsyncpa [#allocation5 + $0x1], 1 }

</bundles_post_ra>
